<compile_context>
chip_gen: v6e
topology: v6e:2x2x1
jax: 0.10.0
libtpu: 0.0.40
codegen_flags: <defaults>
</compile_context>

<pallas_src>
import functools

import jax
import jax.numpy as jnp
from jax.experimental import pallas as pl
from jax.experimental.pallas import tpu as pltpu


def _attention_pool_kernel(x_ref, wd_ref, o_ref, *, heads):
    """Per-batch-tile pooling attention.

    x_ref : (Bt, N, C)  activations (compute dtype, e.g. bf16)
    wd_ref: (C, H)      precomputed W_dots = wk @ (q_proj * head_mask)
    o_ref : (Bt, H, C)  attention-pooled activations (f32); v/proj applied later
    """
    Bt, N, C = x_ref.shape
    x = x_ref[...]                                        # (Bt, N, C)
    x2 = x.reshape(Bt * N, C)

    # Per-head attention logits (no 1/sqrt(dh) scaling, matching the module):
    #   dots[b*N+n, h] = sum_c x[b,n,c] * W_dots[c,h]
    dots = jnp.dot(x2, wd_ref[...],
                   preferred_element_type=jnp.float32)    # (Bt*N, H) f32

    # Softmax over the N keys of each batch element (f32 math).
    dots3 = dots.reshape(Bt, N, heads)
    m = jnp.max(dots3, axis=1, keepdims=True)             # (Bt, 1, H)
    e = jnp.exp(dots3 - m)                                 # (Bt, N, H)
    s = jnp.sum(e, axis=1, keepdims=True)                  # (Bt, 1, H)
    attn = e / s                                           # exact softmax
    # attn_drop: p = 0.0 -> identity

    # Pool the raw activations over N per head (v projection deferred to XLA):
    #   xa[b, h, c] = sum_n attn[b, n, h] * x[b, n, c]
    attn_t = jnp.transpose(attn.astype(x.dtype), (0, 2, 1))           # (Bt, H, N)
    xa = jnp.einsum("bhn,bnc->bhc", attn_t, x,
                    preferred_element_type=jnp.float32)                # (Bt, H, C)
    o_ref[...] = xa.astype(o_ref.dtype)


def _vmem_budget_bytes():
    """~75% of the per-core VMEM capacity (48 MiB fallback, safe on all gens)."""
    cap = 64 * 1024 * 1024          # conservative fallback (v7x per-TC VMEM)
    try:
        info = pltpu.get_tpu_info()
        cap = int(getattr(info, "vmem_capacity_bytes", cap)) or cap
    except Exception:
        pass
    cap = max(cap, 64 * 1024 * 1024)
    return (cap * 3) // 4


def _pick_batch_tile(B, N, C, heads, elt_bytes, vmem_budget):
    """Largest batch tile that (a) divides B, (b) fits the VMEM budget with a
    double-buffered x tile, and (c) leaves >=2 grid steps (v7x has 2 cores)."""
    fixed = 2 * C * heads * elt_bytes                  # resident W_dots (2-buffered)
    per_row = (2 * N * C * elt_bytes                   # x tile, double-buffered
               + N * C * elt_bytes                     # headroom for reshape copies
               + 4 * N * heads * 4                     # dots / exp / attn (f32)
               + 2 * heads * C * 4)                    # output block, double-buffered
    cap = max(1, (vmem_budget - fixed) // per_row)
    if B >= 2:
        cap = min(cap, B // 2)                         # >=2 grid steps
    divisors = [d for d in range(1, B + 1) if B % d == 0 and d <= cap]
    if not divisors:
        return 1
    aligned = [d for d in divisors if d % 8 == 0]      # sublane-aligned preferred
    return max(aligned) if aligned else max(divisors)


def attention_forward(x, params, heads, compute_dtype=jnp.bfloat16):
    """x: (B, N, C). Returns (B, 1, C), matching the PyTorch module output."""
    B, N, C = x.shape
    assert C % heads == 0, f"dim={C} must be divisible by heads={heads}"
    dh = C // heads

    # head-membership mask: hm_ch[c, h] = (c // dh == h)
    hm_ch = (jnp.arange(C)[:, None] // dh
             == jnp.arange(heads)[None, :]).astype(jnp.float32)        # (C, H)

    # ---- hoisted, batch-invariant precompute (plain XLA) -------------------
    # q = to_q(queries) is batch-invariant; fold it and the head split into wk:
    #   W_dots[e, h] = sum_{c in head h} wk[e, c] * q[c]
    # so the in-kernel dots = x @ W_dots are the per-head q.k logits directly.
    q = (params["queries"] @ params["wq"]).reshape(C)                   # (C,)
    w_dots = params["wk"] @ (q[:, None] * hm_ch)                        # (C, H)

    elt = jnp.dtype(compute_dtype).itemsize
    vmem_budget = _vmem_budget_bytes()
    Bt = _pick_batch_tile(B, N, C, heads, elt, vmem_budget)

    grid_spec = pltpu.PrefetchScalarGridSpec(
        num_scalar_prefetch=0,
        grid=(B // Bt,),
        in_specs=[
            pl.BlockSpec((Bt, N, C), lambda b: (b, 0, 0)),   # x batch tile
            pl.BlockSpec((C, heads), lambda b: (0, 0)),      # W_dots (tiny, resident)
        ],
        out_specs=pl.BlockSpec((Bt, heads, C), lambda b: (b, 0, 0)),
    )

    xa = pl.pallas_call(
        functools.partial(_attention_pool_kernel, heads=heads),
        out_shape=jax.ShapeDtypeStruct((B, heads, C), jnp.float32),
        grid_spec=grid_spec,
        compiler_params=pltpu.CompilerParams(
            dimension_semantics=("parallel",),
            vmem_limit_bytes=int(vmem_budget),
        ),
    )(x.astype(compute_dtype), w_dots.astype(compute_dtype))            # (B, H, C)

    # ---- deferred v projection + per-head channel select + output proj -----
    # vh[b,h,c] = sum_e xa[b,h,e] * wv[e,c];  pooled[b,c] = vh[b, c//dh, c]
    vh = jnp.einsum("bhe,ec->bhc", xa, params["wv"])                    # (B, H, C)
    pooled = jnp.einsum("bhc,ch->bc", vh, hm_ch)                        # (B, C)
    out = pooled @ params["wproj"] + params["bproj"]                    # (B, C)
    # proj_drop: p = 0.0 -> identity
    return out[:, None, :]                                              # (B, 1, C)


def init_params(key, dim, heads):
    """Deterministic synthetic parameters (shapes from Attention.__init__)."""
    del heads
    k1, k2, k3, k4, k5, k6 = jax.random.split(key, 6)
    scale = 1.0 / jnp.sqrt(dim)
    # torch Linear.weight is (out, in); we store (in, out) pre-transposed.
    wq = jax.random.normal(k1, (dim, dim), jnp.float32) * scale      # to_q (bias=False)
    wk = jax.random.normal(k2, (dim, dim), jnp.float32) * scale      # to_kv, first half
    wv = jax.random.normal(k3, (dim, dim), jnp.float32) * scale      # to_kv, second half
    wproj = jax.random.normal(k4, (dim, dim), jnp.float32) * scale   # proj weight
    bproj = jax.random.normal(k5, (1, dim), jnp.float32) * scale     # proj bias
    queries = jax.random.normal(k6, (1, dim), jnp.float32)           # nn.Parameter(randn(dim))
    return dict(wq=wq, wk=wk, wv=wv, wproj=wproj, bproj=bproj, queries=queries)


def attention_reference(x, params, heads):
    """Pure-JAX reference mirroring the PyTorch forward, for validation."""
    B, N, C = x.shape
    dh = C // heads
    q = jnp.broadcast_to(params["queries"][None, :, :], (B, 1, C)) @ params["wq"]
    k = x @ params["wk"]
    v = x @ params["wv"]

    def split(t):
        b, n, _ = t.shape
        return t.reshape(b, n, heads, dh).transpose(0, 2, 1, 3)

    qh, kh, vh = split(q), split(k), split(v)
    dots = jnp.einsum("bhqd,bhkd->bhqk", qh, kh)           # no scaling, as in module
    attn = jax.nn.softmax(dots, axis=-1)
    out = jnp.einsum("bhqk,bhkd->bhqd", attn, vh)
    out = out.transpose(0, 2, 1, 3).reshape(B, 1, C)
    return out @ params["wproj"] + params["bproj"]


if __name__ == "__main__":
    B, N, C, H = 2, 8, 32, 8   # dim=32, heads=8 -> dim_head=4
    key = jax.random.PRNGKey(0)
    kx, kp = jax.random.split(key)
    x = jax.random.normal(kx, (B, N, C), jnp.float32)
    params = init_params(kp, C, H)
    ref = attention_reference(x, params, H)

    # f32 compute path: tight check of the restructured kernel math.
    out_f32 = jax.block_until_ready(
        attention_forward(x, params, H, compute_dtype=jnp.float32))
    assert out_f32.shape == (B, 1, C), out_f32.shape
    assert jnp.allclose(out_f32, ref, atol=1e-4, rtol=1e-4), \
        f"f32 max abs diff {jnp.max(jnp.abs(out_f32 - ref))}"

    # bf16 compute path (default; MXU-rate / HBM-optimal). Looser tolerance
    # purely from bf16 rounding of x and W_dots (accumulation is f32).
    out_bf16 = jax.block_until_ready(attention_forward(x, params, H))
    assert out_bf16.shape == (B, 1, C), out_bf16.shape
    assert jnp.allclose(out_bf16, ref, atol=5e-2, rtol=5e-2), \
        f"bf16 max abs diff {jnp.max(jnp.abs(out_bf16 - ref))}"

    print("KERNEL_OK")
</pallas_src>

<mosaic_0001>
module attributes {stable_mosaic.version = 11 : i64} {
  func.func @_attention_pool_kernel(%arg0: i32, %arg1: memref<1x8x32xf32, #tpu.memory_space<vmem>>, %arg2: memref<32x8xf32, #tpu.memory_space<vmem>>, %arg3: memref<1x8x32xf32, #tpu.memory_space<vmem>>) attributes {dimension_semantics = [#tpu.dimension_semantics<parallel>], iteration_bounds = array<i64: 2>, scalar_prefetch = 0 : i64, scratch_operands = 0 : i64, tpu.core_type = #tpu.core_type<tc>, window_params = [{transform_indices = @transform_0, window_bounds = array<i64: 1, 8, 32>}, {pipeline_mode = #tpu.pipeline_mode<synchronous>, transform_indices = @transform_1, window_bounds = array<i64: 32, 8>}, {transform_indices = @transform_2, window_bounds = array<i64: 1, 8, 32>}]} {
    %c0 = arith.constant 0 : index
    %c0_0 = arith.constant 0 : index
    %c0_1 = arith.constant 0 : index
    %0 = vector.load %arg1[%c0, %c0_0, %c0_1] : memref<1x8x32xf32, #tpu.memory_space<vmem>>, vector<1x8x32xf32>
    %1 = vector.shape_cast %0 : vector<1x8x32xf32> to vector<8x32xf32>
    %c0_2 = arith.constant 0 : index
    %c0_3 = arith.constant 0 : index
    %2 = vector.load %arg2[%c0_2, %c0_3] : memref<32x8xf32, #tpu.memory_space<vmem>>, vector<32x8xf32>
    %cst = arith.constant dense<0.000000e+00> : vector<8x8xf32>
    %3 = tpu.matmul %1, %2, %cst {dimension_numbers = #tpu.dot_dimension_numbers<[1], [0], [0], [1], [0, 0, 1, 1], [], []>} : vector<8x32xf32>, vector<32x8xf32>, vector<8x8xf32> -> vector<8x8xf32>
    %4 = vector.shape_cast %3 : vector<8x8xf32> to vector<1x8x8xf32>
    %cst_4 = arith.constant dense<0xFF800000> : vector<1x8xf32>
    %5 = vector.multi_reduction <maximumf>, %4, %cst_4 [1] : vector<1x8x8xf32> to vector<1x8xf32>
    %6 = vector.shape_cast %5 : vector<1x8xf32> to vector<1x1x8xf32>
    %7 = vector.broadcast %6 : vector<1x1x8xf32> to vector<1x8x8xf32>
    %8 = arith.subf %4, %7 : vector<1x8x8xf32>
    %9 = math.exp %8 : vector<1x8x8xf32>
    %cst_5 = arith.constant dense<0.000000e+00> : vector<1x8xf32>
    %10 = vector.multi_reduction <add>, %9, %cst_5 [1] : vector<1x8x8xf32> to vector<1x8xf32>
    %11 = vector.shape_cast %10 : vector<1x8xf32> to vector<1x1x8xf32>
    %12 = vector.broadcast %11 : vector<1x1x8xf32> to vector<1x8x8xf32>
    %13 = arith.divf %9, %12 : vector<1x8x8xf32>
    %14 = tpu.transpose %13, [0, 2, 1] : vector<1x8x8xf32> -> vector<1x8x8xf32>
    "tpu.trace_start"() <{level = 10 : i32, message = "bhn,bnc->bhc"}> : () -> ()
    %cst_6 = arith.constant dense<0.000000e+00> : vector<1x8x32xf32>
    %15 = tpu.matmul %14, %0, %cst_6 {dimension_numbers = #tpu.dot_dimension_numbers<[2], [1], [1], [2], [0, 0, 0, 1, 1, 2], [0], [0]>} : vector<1x8x8xf32>, vector<1x8x32xf32>, vector<1x8x32xf32> -> vector<1x8x32xf32>
    "tpu.trace_stop"() : () -> ()
    %c0_7 = arith.constant 0 : index
    %c0_8 = arith.constant 0 : index
    %c0_9 = arith.constant 0 : index
    %16 = vector.load %arg3[%c0_7, %c0_8, %c0_9] : memref<1x8x32xf32, #tpu.memory_space<vmem>>, vector<1x8x32xf32>
    tpu.vector_store %arg3[%c0_7, %c0_8, %c0_9], %15 {strides = array<i32>} : memref<1x8x32xf32, #tpu.memory_space<vmem>>, vector<1x8x32xf32>,
    return
  }
  func.func @transform_0(%arg0: i32) -> (i32, i32, i32) {
    %c0_i32 = arith.constant 0 : i32
    %c0_i32_0 = arith.constant 0 : i32
    %c0_i32_1 = arith.constant 0 : i32
    return %arg0, %c0_i32, %c0_i32_0 : i32, i32, i32
  }
  func.func @transform_1(%arg0: i32) -> (i32, i32) {
    %c0_i32 = arith.constant 0 : i32
    %c0_i32_0 = arith.constant 0 : i32
    %c0_i32_1 = arith.constant 0 : i32
    return %c0_i32, %c0_i32_0 : i32, i32
  }
  func.func @transform_2(%arg0: i32) -> (i32, i32, i32) {
    %c0_i32 = arith.constant 0 : i32
    %c0_i32_0 = arith.constant 0 : i32
    %c0_i32_1 = arith.constant 0 : i32
    return %arg0, %c0_i32, %c0_i32_0 : i32, i32, i32
  }
}

</mosaic_0001>

<bundles_post_ra>
// kernel: tpu_custom_call.1
= control target key start
LH: loop header
LB: loop body
LE: loop exit
PB: predicated region body
PF: predicated region fallthrough
CT: control target
= control target key end

     0   :  { %7 = vsyncpa [#allocation3], 0  ;;  %s693_s0 = inlined_call_operand.vmem [shape: f32[2,8,32], index: 0, kind: input, shape index: {}]   ;;  %s694_s1 = inlined_call_operand.vmem [shape: f32[32,8], index: 1, kind: input, shape index: {}]   ;;  %s695_s2 = inlined_call_operand.hbm [shape: f32[2,8,32], index: 2, kind: output, shape index: {}]  }
   0x1   :  { %9 = vsyncpa [#allocation3 + $0x1], 0  ;;  %s577_s9 = smov 0   ;;  %s579_s10 = smov 0  }
   0x2   :  { %s581_s11 = smov 0   ;;  %s583_s12 = smov 0  }
   0x3 LB: > { %s598_s13 = sadd.s32 4294967295, %s557_s12   ;;  %s417_s14 = sadd.s32 4294967294, %s557_s12   ;;  %s557_s12 = sphi %s583_s12, %s701_s12   ;;  %s553_s11 = sphi %s581_s11, %s700_s11   ;;  %s549_s10 = sphi %s579_s10, %s699_s10   ;;  %s545_s9 = sphi %s577_s9, %s698_s9  }
   0x4   : > { %s602_s15 = sadd.s32 1, %s557_s12   ;;  %s69_s16 = sadd.s32 1, %s553_s11 }
   0x5   : > { %s66_s17 = ssub.s32 %s557_s12, %s602_s15  ;;  %p79_p0 = scmp.ne.s32.totalorder %s553_s11, %s549_s10 }
   0x6   : > { %p67_p1 = scmp.eq.s32.totalorder %s66_s17, 0  ;;  %p80_p2 = scmp.eq.s32.totalorder %s598_s13, 1 }
   0x7   : > { %p85_p3 = scmp.ne.s32.totalorder %s549_s10, %s545_s9  ;;  %p86_p4 = scmp.eq.s32.totalorder %s417_s14, 1 }
   0x8   : > { %s613_s18 = scalar_select %p67_p1, %s553_s11, %s69_s16  }
   0x9   : > { %p615_p5 = por %p80_p2, %p79_p0  ;;  %p619_p6 = por %p86_p4, %p85_p3 }
   0xa   : > { %p420_p7 = scmp.ge.s32.totalorder %s557_s12, 1  ;;  %p114_p8 = scmp.lt.s32.totalorder %s557_s12, 3 }
   0xc   : > { %p115_p9 = pnand %p420_p7, %p114_p8 }
   0xd   : > { %p135_p10 = scmp.lt.s32.totalorder (!%p115_p9), %s598_s13, 1  ;;  %s132_s6 = sand.u32 (!%p115_p9), 1, %s549_s10  }
   0xe   : > { %118 = sbr.rel (%p115_p9) target bundleno = 613 (0x265), region = 28  ;;  %s421_s7 = sshll.u32 (!%p115_p9), %s132_s6, 3 }
   0xf   : > { %s426_s8 = sshll.u32 (!%p115_p9), %s598_s13, 7  ;;  %s134_s14 = scalar_lea.vmem (!%p115_p9), [#allocation2], %s421_s7 }
  0x10   : > { %s358_s16 = sshll.u32 (!%p115_p9), %s134_s14, 4  ;;  %s651_s22 = scalar_lea.hbm (!%p115_p9), %s695_s2, %s426_s8  ;;  %s653_s16 = int_to_ptr.vmem [resolvable:$true] %s358_s16 }
  0x11   : > { %s345_s23 = scalar_lea.sflag (!%p115_p9), [#allocation3], %s132_s6  ;;  %s497_s24 = scalar_lea.vmem (!%p115_p9), %s653_s16, 128 }
  0x12   : > { %p498_p11 = scmp.ne.s32.totalorder (!%p115_p9), %s653_s16, %s497_s24 }
  0x13   : > { %v143_v0 = vld [vmem:[%s694_s1 + $0x18] sm:$0xff]  ;;  %v559_v1 = vmov 0.0   ;;  %v142_v2 = vld [vmem:[%s694_s1 + $0x10] sm:$0xff]  ;;  %vm560_vm0 = vmmov 0   ;;  %s136_s25 = scalar_select %p135_p10, %s598_s13, 1  ;;  %v141_v3 = vld [vmem:[%s694_s1 + $0x8] sm:$0xff] }
  0x14   : > { %436 = vmatprep.subr.mxu0 %v559_v1  ;;  %444 = vmatprep.mubr.msk.f32.mxu0 %vm560_vm0, %v559_v1  ;;  %v140_v4 = vld [vmem:[%s694_s1] sm:$0xff]  ;;  %vm144_vm1 = vcmask 261120   ;;  %vm218_vm2 = vcmask 64512   ;;  %p499_p12 = pnand %p498_p11, %p615_p5  ;;  %s561_s13 = smov [#allocation2]  }
  0x15   : > { %437 = vmatpush3.msra.mxu0 %v143_v0  ;;  %447 = vmatprep.subr.mxu1 %v559_v1  ;;  %s422_s28 = sshll.u32 %s136_s25, 3  ;;  %s501_s25 = sshll.u32 %s561_s13, 4  ;;  %s502_s25 = int_to_ptr.vmem [resolvable:$false] %s501_s25 }
  0x16   : > { %438 = vmatprep.subr.mxu0 %v559_v1  ;;  %449 = vmatprep.mubr.msk.f32.mxu1 %vm560_vm0, %v559_v1  ;;  %s138_s5 = scalar_lea.vmem %s693_s0, %s422_s28  ;;  %p500_p13 = pneg %p499_p12 }
  0x17   : > { %439 = vmatpush3.msra.mxu0 %v142_v2  ;;  %v139_v5 = vld [vmem:[%s138_s5] sm:$0xff]  ;;  %s503_s26 = scalar_lea.vmem %s502_s25, 256  ;;  %p504_p0 = scmp.lt.s32.totalorder %s653_s16, %s502_s25 }
  0x18   : > { %440 = vmatprep.subr.mxu0 %v559_v1  ;;  %448 = vmatpush3.msra.mxu1 %v139_v5  ;;  %p505_p1 = scmp.lt.s32.totalorder %s503_s26, %s497_s24 }
  0x19   : > { %441 = vmatpush3.msra.mxu0 %v141_v3 }
  0x1a   : > { %442 = vmatprep.subr.mxu0 %v559_v1  ;;  %p506_p2 = por %p505_p1, %p504_p0 }
  0x1b   : > { %443 = vmatpush3.msra.mxu0 %v140_v4 }
  0x1c   : > { %445 = vmatmul.mubr.msk.f32.vlgmr.msra.gmra.mxu0 %vm144_vm1, %v139_v5  ;;  %p507_p3 = pnand %p506_p2, %p500_p13 }
  0xdc   : > { %v214_v6 = vpop.f32.mrf.mxu0 }
  0xdd   : > { %v219_v7 = vsel %vm218_vm2, %v214_v6, -inf }
  0xde   : > { %v220_v8 = vrot.slane %v219_v7, 4  ;;  %v446_v9 = vpop.f32.mrf.mxu0 }
  0xe0   : > { %v221_v10 = vmax.f32 %v219_v7, %v220_v8 }
  0xe2   : > { %v222_v11 = vrot.slane %v221_v10, 2 }
  0xe4   : > { %v223_v12 = vmax.f32 %v221_v10, %v222_v11 }
  0xe6   : > { %v224_v13 = vrot.slane %v223_v12, 1 }
  0xe8   : > { %v225_v14 = vmax.f32 %v223_v12, %v224_v13 }
  0xea   : > { %v226_v15 = vsub.f32 %v214_v6, %v225_v14 }
  0xec   : > { %v227_v16 = vmul.f32 1.442695, %v226_v15 }
  0xee   : > { %493 = vpow2.f32 %v227_v16 }
  0xfb   : > { %v494_v17 = vpop.eup %493 }
  0xfc   : > { %v229_v18 = vsel %vm218_vm2, %v494_v17, 0.0 }
  0xfd   : > { %v230_v19 = vrot.slane %v229_v18, 4 }
  0xff   : > { %v231_v20 = vadd.f32 %v230_v19, %v229_v18 }
 0x101   : > { %v232_v21 = vrot.slane %v231_v20, 2 }
 0x103   : > { %v233_v22 = vadd.f32 %v232_v21, %v231_v20 }
 0x105   : > { %v234_v23 = vrot.slane %v233_v22, 1 }
 0x107   : > { %v235_v24 = vadd.f32 %v234_v23, %v233_v22 }
 0x109   : > { %495 = vrcp.f32 %v235_v24 }
 0x116   : > { %v496_v25 = vpop.eup %495 }
 0x117   : > { %v237_v26 = vmul.f32 %v496_v25, %v494_v17 }
 0x119   : > { %238 = vxpose.xlu0.b32.start.end [1/1] (short) (narrow) %v237_v26, 8 }
 0x195   : > { %v254_v27 = vpop.trf.xlu0 }
 0x196   : > { %450 = vmatmul.mubr.msk.f32.vlgmr.msra.gmra.mxu1 %vm218_vm2, %v254_v27 }
 0x256   : > { %v339_v28 = vpop.f32.mrf.mxu1 }
 0x257   : > { %343 = vst.msk [vmem:[%s134_s14] sm:$0xff] %vm144_vm1, %v339_v28 }
 0x258   : > { %v451_v29 = vpop.f32.mrf.mxu1 }
 0x259   : > { %510 = shalt.err (!%p507_p3)
}
 0x25a   : > { %s511_s27 = scalar_lea.hbm %s651_s22, 128  ;;  %s515_s30 = scalar_lea.hbm %s695_s2, 256 }
 0x25b   : > { %p512_p4 = scmp.ne.s32.totalorder %s651_s22, %s511_s27  ;;  %p516_p9 = scmp.lt.s32.totalorder %s651_s22, %s695_s2 }
 0x25c   : > { %p517_p10 = scmp.lt.s32.totalorder %s515_s30, %s511_s27 }
 0x25d   : > { %p513_p7 = pnand %p512_p4, %p615_p5 }
 0x25e   : > { %p518_p11 = por %p517_p10, %p516_p9 }
 0x25f   : > { %p514_p8 = pneg %p513_p7 }
 0x261   : > { %p519_p12 = pnand %p518_p11, %p514_p8 }
 0x263   : > { %522 = shalt.err (!%p519_p12)
}
 0x264   : > { %452 = dma.vmem_to_hbm [thread:$0]  (%p615_p5), %s653_s16, 128, %s651_s22, %s345_s23  }
 0x265 PF: > { %p458_p13 = scmp.ge.s32.totalorder %s557_s12, 2  ;;  %s370_s5 = sand.u32 1, %s545_s9  }
 0x266   : > { %s371_s6 = scalar_lea.sflag [#allocation3], %s370_s5 }
 0x267   : > { %p455_p0 = pnand %p458_p13, %p619_p6 }
 0x269   : > { %p456_p1 = pneg %p455_p0 }
 0x26b   : > { %540 = dma.done.wait (%p456_p1), %s371_s6, 128  }
 0x26c   : > { %542 = vsyncadd (%p456_p1), %s371_s6, 4294967168  ;;  %p12_p2 = scmp.ge.s32.totalorder %s602_s15, 4   ;;  %s698_s9 = smov %s549_s10 }
 0x26d   : > { %s699_s10 = smov %s553_s11  ;;  %s700_s11 = smov %s613_s18 }
 0x26e   : > { %s701_s12 = smov %s602_s15  ;;  %14 = sbr.rel (!%p12_p2) target bundleno = 3 (0x3), region = 63 }
 0x273   :  { %376 = vsyncpa [#allocation3], 1 }
 0x274   :  { %378 = vsyncpa [#allocation3 + $0x1], 1 }

</bundles_post_ra>
